<compile_context>
chip_gen: v5e
topology: v5e:2x2
jax: 0.10.0
libtpu: 0.0.40
codegen_flags: <defaults>
</compile_context>

<pallas_src>
import jax
import jax.numpy as jnp
from jax import lax
from jax.experimental import pallas as pl
from jax.experimental.pallas import tpu as pltpu


def cl_rollout_kernel(w_ref, Mt_ref, Gt_ref, xs_ref, us_ref):
    """Whole closed-loop rollout in one kernel invocation.

    w_ref  : (B, T, n)  disturbance sequence (batch-major, whole array in VMEM)
    Mt_ref : (n, n)     pre-transposed closed-loop matrix  M.T = (A + B K C).T
    Gt_ref : (n, m)     pre-transposed output-feedback map G.T = (K C).T
    xs_ref : (B, T, n)  state trajectory output
    us_ref : (B, T, m)  control trajectory output
    """
    batch, T, n = w_ref.shape

    # Resident parameters: loaded once, reused across all timesteps.
    Mt = Mt_ref[...]            # (n, n)
    Gt = Gt_ref[...]            # (n, m)

    # Fully-unrolled static loop: T is a compile-time constant and small here, so
    # every ref index below is static and the scheduler sees the whole recurrence.
    # TODO(synk): for long horizons, chunk T over an "arbitrary" grid axis with the
    # carry held in a VMEM scratch to bound unrolled code size / VMEM footprint.
    x_pre = jnp.zeros((batch, n), dtype=jnp.float32)
    for t in range(T):
        # x_t = A x_{t-1} + B u_{t-1} + w_t  ==  x_pre + w_t
        x = x_pre + w_ref[:, t, :]
        xs_ref[:, t, :] = x.astype(xs_ref.dtype)

        # u_t = K C x_t = G x_t  -- off the serial path (does not feed the carry).
        us_ref[:, t, :] = jnp.dot(
            x, Gt, preferred_element_type=jnp.float32
        ).astype(us_ref.dtype)

        # Serial carry: x_pre_{t+1} = A x_t + B u_t = M x_t  (single matmul on the chain).
        x_pre = jnp.dot(x, Mt, preferred_element_type=jnp.float32)


@jax.jit
def cl_system_forward(data, A, Bm, C, K):
    """Pallas implementation of CLSystem.forward -> (xs, us).

    data: (batch, T, n) float32 disturbance sequence (batch-major).
    Returns xs: (batch, T, n), us: (batch, T, m).
    """
    batch, T, n = data.shape
    m = Bm.shape[1]

    # One-time algebraic pre-composition of the closed loop (done in XLA).
    G = K @ C                                   # (m, n):  u_t = G x_t
    M = A + Bm @ G                              # (n, n):  x_pre_{t+1} = M x_t
    Mt = jnp.asarray(M.T, dtype=jnp.float32)    # pre-transposed for x @ Mt
    Gt = jnp.asarray(G.T, dtype=jnp.float32)    # pre-transposed for x @ Gt
    w = data.astype(jnp.float32)

    vmem = pltpu.MemorySpace.VMEM
    xs, us = pl.pallas_call(
        cl_rollout_kernel,
        out_shape=(
            jax.ShapeDtypeStruct((batch, T, n), jnp.float32),
            jax.ShapeDtypeStruct((batch, T, m), jnp.float32),
        ),
        in_specs=[
            pl.BlockSpec(memory_space=vmem),   # w       (whole array, one DMA)
            pl.BlockSpec(memory_space=vmem),   # M.T     (resident parameter)
            pl.BlockSpec(memory_space=vmem),   # G.T     (resident parameter)
        ],
        out_specs=(
            pl.BlockSpec(memory_space=vmem),   # xs      (one writeback DMA)
            pl.BlockSpec(memory_space=vmem),   # us      (one writeback DMA)
        ),
    )(w, Mt, Gt)

    return xs, us


def reference_forward(data, A, Bm, C, K):
    """Pure-JAX reference of the same (un-composed) closed-loop rollout."""
    w = jnp.transpose(data, (1, 0, 2)).astype(jnp.float32)  # (T, B, n)
    batch = data.shape[0]
    n = A.shape[0]

    def step(x_pre, w_t):
        x = x_pre + w_t
        y = x @ C.T
        u = y @ K.T
        x_pre_next = x @ A.T + u @ Bm.T
        return x_pre_next, (x, u)

    _, (xs, us) = lax.scan(step, jnp.zeros((batch, n), jnp.float32), w)
    return jnp.transpose(xs, (1, 0, 2)), jnp.transpose(us, (1, 0, 2))


if __name__ == "__main__":
    # Small, deterministic problem: batch=2, horizon T=8, state n=4,
    # measurement p=3, control m=2.
    batch, T, n, p, m = 2, 8, 4, 3, 2

    key = jax.random.PRNGKey(0)
    k_w, k_a, k_b, k_c, k_k = jax.random.split(key, 5)

    data = jax.random.normal(k_w, (batch, T, n), dtype=jnp.float32)

    # Deterministic synthetic parameters (stable-ish dynamics).
    A = 0.4 * jax.random.normal(k_a, (n, n), dtype=jnp.float32)
    Bm = 0.5 * jax.random.normal(k_b, (n, m), dtype=jnp.float32)
    C = 0.5 * jax.random.normal(k_c, (p, n), dtype=jnp.float32)
    K = 0.3 * jax.random.normal(k_k, (m, p), dtype=jnp.float32)

    xs, us = cl_system_forward(data, A, Bm, C, K)
    xs = jax.block_until_ready(xs)
    us = jax.block_until_ready(us)

    xs_ref, us_ref = reference_forward(data, A, Bm, C, K)

    assert xs.shape == (batch, T, n) and us.shape == (batch, T, m)
    assert jnp.allclose(xs, xs_ref, atol=1e-5, rtol=1e-5)
    assert jnp.allclose(us, us_ref, atol=1e-5, rtol=1e-5)

    print("KERNEL_OK")
</pallas_src>

<mosaic_0001>
module attributes {stable_mosaic.version = 11 : i64} {
  func.func @cl_rollout_kernel(%arg0: memref<2x8x4xf32, #tpu.memory_space<vmem>>, %arg1: memref<4x4xf32, #tpu.memory_space<vmem>>, %arg2: memref<4x2xf32, #tpu.memory_space<vmem>>, %arg3: memref<2x8x4xf32, #tpu.memory_space<vmem>>, %arg4: memref<2x8x2xf32, #tpu.memory_space<vmem>>) attributes {dimension_semantics = [], scalar_prefetch = 0 : i64, scratch_operands = 0 : i64, tpu.core_type = #tpu.core_type<tc>} {
    %c0 = arith.constant 0 : index
    %c0_0 = arith.constant 0 : index
    %0 = vector.load %arg1[%c0, %c0_0] : memref<4x4xf32, #tpu.memory_space<vmem>>, vector<4x4xf32>
    %c0_1 = arith.constant 0 : index
    %c0_2 = arith.constant 0 : index
    %1 = vector.load %arg2[%c0_1, %c0_2] : memref<4x2xf32, #tpu.memory_space<vmem>>, vector<4x2xf32>
    %cst = arith.constant 0.000000e+00 : f32
    %2 = vector.broadcast %cst : f32 to vector<2x4xf32>
    %c0_3 = arith.constant 0 : index
    %c0_4 = arith.constant 0 : index
    %c0_5 = arith.constant 0 : index
    %3 = vector.load %arg0[%c0_3, %c0_4, %c0_5] : memref<2x8x4xf32, #tpu.memory_space<vmem>>, vector<2x1x4xf32>
    %4 = vector.shape_cast %3 : vector<2x1x4xf32> to vector<2x4xf32>
    %5 = arith.addf %2, %4 : vector<2x4xf32>
    %c0_6 = arith.constant 0 : index
    %c0_7 = arith.constant 0 : index
    %c0_8 = arith.constant 0 : index
    %6 = vector.load %arg3[%c0_6, %c0_7, %c0_8] : memref<2x8x4xf32, #tpu.memory_space<vmem>>, vector<2x1x4xf32>
    %7 = vector.shape_cast %6 : vector<2x1x4xf32> to vector<2x4xf32>
    %8 = vector.shape_cast %5 : vector<2x4xf32> to vector<2x1x4xf32>
    tpu.vector_store %arg3[%c0_6, %c0_7, %c0_8], %8 {strides = array<i32>} : memref<2x8x4xf32, #tpu.memory_space<vmem>>, vector<2x1x4xf32>,
    %cst_9 = arith.constant dense<0.000000e+00> : vector<2x2xf32>
    %9 = tpu.matmul %5, %1, %cst_9 {dimension_numbers = #tpu.dot_dimension_numbers<[1], [0], [0], [1], [0, 0, 1, 1], [], []>} : vector<2x4xf32>, vector<4x2xf32>, vector<2x2xf32> -> vector<2x2xf32>
    %c0_10 = arith.constant 0 : index
    %c0_11 = arith.constant 0 : index
    %c0_12 = arith.constant 0 : index
    %10 = vector.load %arg4[%c0_10, %c0_11, %c0_12] : memref<2x8x2xf32, #tpu.memory_space<vmem>>, vector<2x1x2xf32>
    %11 = vector.shape_cast %10 : vector<2x1x2xf32> to vector<2x2xf32>
    %12 = vector.shape_cast %9 : vector<2x2xf32> to vector<2x1x2xf32>
    tpu.vector_store %arg4[%c0_10, %c0_11, %c0_12], %12 {strides = array<i32>} : memref<2x8x2xf32, #tpu.memory_space<vmem>>, vector<2x1x2xf32>,
    %cst_13 = arith.constant dense<0.000000e+00> : vector<2x4xf32>
    %13 = tpu.matmul %5, %0, %cst_13 {dimension_numbers = #tpu.dot_dimension_numbers<[1], [0], [0], [1], [0, 0, 1, 1], [], []>} : vector<2x4xf32>, vector<4x4xf32>, vector<2x4xf32> -> vector<2x4xf32>
    %c0_14 = arith.constant 0 : index
    %c1 = arith.constant 1 : index
    %c0_15 = arith.constant 0 : index
    %14 = vector.load %arg0[%c0_14, %c1, %c0_15] : memref<2x8x4xf32, #tpu.memory_space<vmem>>, vector<2x1x4xf32>
    %15 = vector.shape_cast %14 : vector<2x1x4xf32> to vector<2x4xf32>
    %16 = arith.addf %13, %15 : vector<2x4xf32>
    %c0_16 = arith.constant 0 : index
    %c1_17 = arith.constant 1 : index
    %c0_18 = arith.constant 0 : index
    %17 = vector.load %arg3[%c0_16, %c1_17, %c0_18] : memref<2x8x4xf32, #tpu.memory_space<vmem>>, vector<2x1x4xf32>
    %18 = vector.shape_cast %17 : vector<2x1x4xf32> to vector<2x4xf32>
    %19 = vector.shape_cast %16 : vector<2x4xf32> to vector<2x1x4xf32>
    tpu.vector_store %arg3[%c0_16, %c1_17, %c0_18], %19 {strides = array<i32>} : memref<2x8x4xf32, #tpu.memory_space<vmem>>, vector<2x1x4xf32>,
    %cst_19 = arith.constant dense<0.000000e+00> : vector<2x2xf32>
    %20 = tpu.matmul %16, %1, %cst_19 {dimension_numbers = #tpu.dot_dimension_numbers<[1], [0], [0], [1], [0, 0, 1, 1], [], []>} : vector<2x4xf32>, vector<4x2xf32>, vector<2x2xf32> -> vector<2x2xf32>
    %c0_20 = arith.constant 0 : index
    %c1_21 = arith.constant 1 : index
    %c0_22 = arith.constant 0 : index
    %21 = vector.load %arg4[%c0_20, %c1_21, %c0_22] : memref<2x8x2xf32, #tpu.memory_space<vmem>>, vector<2x1x2xf32>
    %22 = vector.shape_cast %21 : vector<2x1x2xf32> to vector<2x2xf32>
    %23 = vector.shape_cast %20 : vector<2x2xf32> to vector<2x1x2xf32>
    tpu.vector_store %arg4[%c0_20, %c1_21, %c0_22], %23 {strides = array<i32>} : memref<2x8x2xf32, #tpu.memory_space<vmem>>, vector<2x1x2xf32>,
    %cst_23 = arith.constant dense<0.000000e+00> : vector<2x4xf32>
    %24 = tpu.matmul %16, %0, %cst_23 {dimension_numbers = #tpu.dot_dimension_numbers<[1], [0], [0], [1], [0, 0, 1, 1], [], []>} : vector<2x4xf32>, vector<4x4xf32>, vector<2x4xf32> -> vector<2x4xf32>
    %c0_24 = arith.constant 0 : index
    %c2 = arith.constant 2 : index
    %c0_25 = arith.constant 0 : index
    %25 = vector.load %arg0[%c0_24, %c2, %c0_25] : memref<2x8x4xf32, #tpu.memory_space<vmem>>, vector<2x1x4xf32>
    %26 = vector.shape_cast %25 : vector<2x1x4xf32> to vector<2x4xf32>
    %27 = arith.addf %24, %26 : vector<2x4xf32>
    %c0_26 = arith.constant 0 : index
    %c2_27 = arith.constant 2 : index
    %c0_28 = arith.constant 0 : index
    %28 = vector.load %arg3[%c0_26, %c2_27, %c0_28] : memref<2x8x4xf32, #tpu.memory_space<vmem>>, vector<2x1x4xf32>
    %29 = vector.shape_cast %28 : vector<2x1x4xf32> to vector<2x4xf32>
    %30 = vector.shape_cast %27 : vector<2x4xf32> to vector<2x1x4xf32>
    tpu.vector_store %arg3[%c0_26, %c2_27, %c0_28], %30 {strides = array<i32>} : memref<2x8x4xf32, #tpu.memory_space<vmem>>, vector<2x1x4xf32>,
    %cst_29 = arith.constant dense<0.000000e+00> : vector<2x2xf32>
    %31 = tpu.matmul %27, %1, %cst_29 {dimension_numbers = #tpu.dot_dimension_numbers<[1], [0], [0], [1], [0, 0, 1, 1], [], []>} : vector<2x4xf32>, vector<4x2xf32>, vector<2x2xf32> -> vector<2x2xf32>
    %c0_30 = arith.constant 0 : index
    %c2_31 = arith.constant 2 : index
    %c0_32 = arith.constant 0 : index
    %32 = vector.load %arg4[%c0_30, %c2_31, %c0_32] : memref<2x8x2xf32, #tpu.memory_space<vmem>>, vector<2x1x2xf32>
    %33 = vector.shape_cast %32 : vector<2x1x2xf32> to vector<2x2xf32>
    %34 = vector.shape_cast %31 : vector<2x2xf32> to vector<2x1x2xf32>
    tpu.vector_store %arg4[%c0_30, %c2_31, %c0_32], %34 {strides = array<i32>} : memref<2x8x2xf32, #tpu.memory_space<vmem>>, vector<2x1x2xf32>,
    %cst_33 = arith.constant dense<0.000000e+00> : vector<2x4xf32>
    %35 = tpu.matmul %27, %0, %cst_33 {dimension_numbers = #tpu.dot_dimension_numbers<[1], [0], [0], [1], [0, 0, 1, 1], [], []>} : vector<2x4xf32>, vector<4x4xf32>, vector<2x4xf32> -> vector<2x4xf32>
    %c0_34 = arith.constant 0 : index
    %c3 = arith.constant 3 : index
    %c0_35 = arith.constant 0 : index
    %36 = vector.load %arg0[%c0_34, %c3, %c0_35] : memref<2x8x4xf32, #tpu.memory_space<vmem>>, vector<2x1x4xf32>
    %37 = vector.shape_cast %36 : vector<2x1x4xf32> to vector<2x4xf32>
    %38 = arith.addf %35, %37 : vector<2x4xf32>
    %c0_36 = arith.constant 0 : index
    %c3_37 = arith.constant 3 : index
    %c0_38 = arith.constant 0 : index
    %39 = vector.load %arg3[%c0_36, %c3_37, %c0_38] : memref<2x8x4xf32, #tpu.memory_space<vmem>>, vector<2x1x4xf32>
    %40 = vector.shape_cast %39 : vector<2x1x4xf32> to vector<2x4xf32>
    %41 = vector.shape_cast %38 : vector<2x4xf32> to vector<2x1x4xf32>
    tpu.vector_store %arg3[%c0_36, %c3_37, %c0_38], %41 {strides = array<i32>} : memref<2x8x4xf32, #tpu.memory_space<vmem>>, vector<2x1x4xf32>,
    %cst_39 = arith.constant dense<0.000000e+00> : vector<2x2xf32>
    %42 = tpu.matmul %38, %1, %cst_39 {dimension_numbers = #tpu.dot_dimension_numbers<[1], [0], [0], [1], [0, 0, 1, 1], [], []>} : vector<2x4xf32>, vector<4x2xf32>, vector<2x2xf32> -> vector<2x2xf32>
    %c0_40 = arith.constant 0 : index
    %c3_41 = arith.constant 3 : index
    %c0_42 = arith.constant 0 : index
    %43 = vector.load %arg4[%c0_40, %c3_41, %c0_42] : memref<2x8x2xf32, #tpu.memory_space<vmem>>, vector<2x1x2xf32>
    %44 = vector.shape_cast %43 : vector<2x1x2xf32> to vector<2x2xf32>
    %45 = vector.shape_cast %42 : vector<2x2xf32> to vector<2x1x2xf32>
    tpu.vector_store %arg4[%c0_40, %c3_41, %c0_42], %45 {strides = array<i32>} : memref<2x8x2xf32, #tpu.memory_space<vmem>>, vector<2x1x2xf32>,
    %cst_43 = arith.constant dense<0.000000e+00> : vector<2x4xf32>
    %46 = tpu.matmul %38, %0, %cst_43 {dimension_numbers = #tpu.dot_dimension_numbers<[1], [0], [0], [1], [0, 0, 1, 1], [], []>} : vector<2x4xf32>, vector<4x4xf32>, vector<2x4xf32> -> vector<2x4xf32>
    %c0_44 = arith.constant 0 : index
    %c4 = arith.constant 4 : index
    %c0_45 = arith.constant 0 : index
    %47 = vector.load %arg0[%c0_44, %c4, %c0_45] : memref<2x8x4xf32, #tpu.memory_space<vmem>>, vector<2x1x4xf32>
    %48 = vector.shape_cast %47 : vector<2x1x4xf32> to vector<2x4xf32>
    %49 = arith.addf %46, %48 : vector<2x4xf32>
    %c0_46 = arith.constant 0 : index
    %c4_47 = arith.constant 4 : index
    %c0_48 = arith.constant 0 : index
    %50 = vector.load %arg3[%c0_46, %c4_47, %c0_48] : memref<2x8x4xf32, #tpu.memory_space<vmem>>, vector<2x1x4xf32>
    %51 = vector.shape_cast %50 : vector<2x1x4xf32> to vector<2x4xf32>
    %52 = vector.shape_cast %49 : vector<2x4xf32> to vector<2x1x4xf32>
    tpu.vector_store %arg3[%c0_46, %c4_47, %c0_48], %52 {strides = array<i32>} : memref<2x8x4xf32, #tpu.memory_space<vmem>>, vector<2x1x4xf32>,
    %cst_49 = arith.constant dense<0.000000e+00> : vector<2x2xf32>
    %53 = tpu.matmul %49, %1, %cst_49 {dimension_numbers = #tpu.dot_dimension_numbers<[1], [0], [0], [1], [0, 0, 1, 1], [], []>} : vector<2x4xf32>, vector<4x2xf32>, vector<2x2xf32> -> vector<2x2xf32>
    %c0_50 = arith.constant 0 : index
    %c4_51 = arith.constant 4 : index
    %c0_52 = arith.constant 0 : index
    %54 = vector.load %arg4[%c0_50, %c4_51, %c0_52] : memref<2x8x2xf32, #tpu.memory_space<vmem>>, vector<2x1x2xf32>
    %55 = vector.shape_cast %54 : vector<2x1x2xf32> to vector<2x2xf32>
    %56 = vector.shape_cast %53 : vector<2x2xf32> to vector<2x1x2xf32>
    tpu.vector_store %arg4[%c0_50, %c4_51, %c0_52], %56 {strides = array<i32>} : memref<2x8x2xf32, #tpu.memory_space<vmem>>, vector<2x1x2xf32>,
    %cst_53 = arith.constant dense<0.000000e+00> : vector<2x4xf32>
    %57 = tpu.matmul %49, %0, %cst_53 {dimension_numbers = #tpu.dot_dimension_numbers<[1], [0], [0], [1], [0, 0, 1, 1], [], []>} : vector<2x4xf32>, vector<4x4xf32>, vector<2x4xf32> -> vector<2x4xf32>
    %c0_54 = arith.constant 0 : index
    %c5 = arith.constant 5 : index
    %c0_55 = arith.constant 0 : index
    %58 = vector.load %arg0[%c0_54, %c5, %c0_55] : memref<2x8x4xf32, #tpu.memory_space<vmem>>, vector<2x1x4xf32>
    %59 = vector.shape_cast %58 : vector<2x1x4xf32> to vector<2x4xf32>
    %60 = arith.addf %57, %59 : vector<2x4xf32>
    %c0_56 = arith.constant 0 : index
    %c5_57 = arith.constant 5 : index
    %c0_58 = arith.constant 0 : index
    %61 = vector.load %arg3[%c0_56, %c5_57, %c0_58] : memref<2x8x4xf32, #tpu.memory_space<vmem>>, vector<2x1x4xf32>
    %62 = vector.shape_cast %61 : vector<2x1x4xf32> to vector<2x4xf32>
    %63 = vector.shape_cast %60 : vector<2x4xf32> to vector<2x1x4xf32>
    tpu.vector_store %arg3[%c0_56, %c5_57, %c0_58], %63 {strides = array<i32>} : memref<2x8x4xf32, #tpu.memory_space<vmem>>, vector<2x1x4xf32>,
    %cst_59 = arith.constant dense<0.000000e+00> : vector<2x2xf32>
    %64 = tpu.matmul %60, %1, %cst_59 {dimension_numbers = #tpu.dot_dimension_numbers<[1], [0], [0], [1], [0, 0, 1, 1], [], []>} : vector<2x4xf32>, vector<4x2xf32>, vector<2x2xf32> -> vector<2x2xf32>
    %c0_60 = arith.constant 0 : index
    %c5_61 = arith.constant 5 : index
    %c0_62 = arith.constant 0 : index
    %65 = vector.load %arg4[%c0_60, %c5_61, %c0_62] : memref<2x8x2xf32, #tpu.memory_space<vmem>>, vector<2x1x2xf32>
    %66 = vector.shape_cast %65 : vector<2x1x2xf32> to vector<2x2xf32>
    %67 = vector.shape_cast %64 : vector<2x2xf32> to vector<2x1x2xf32>
    tpu.vector_store %arg4[%c0_60, %c5_61, %c0_62], %67 {strides = array<i32>} : memref<2x8x2xf32, #tpu.memory_space<vmem>>, vector<2x1x2xf32>,
    %cst_63 = arith.constant dense<0.000000e+00> : vector<2x4xf32>
    %68 = tpu.matmul %60, %0, %cst_63 {dimension_numbers = #tpu.dot_dimension_numbers<[1], [0], [0], [1], [0, 0, 1, 1], [], []>} : vector<2x4xf32>, vector<4x4xf32>, vector<2x4xf32> -> vector<2x4xf32>
    %c0_64 = arith.constant 0 : index
    %c6 = arith.constant 6 : index
    %c0_65 = arith.constant 0 : index
    %69 = vector.load %arg0[%c0_64, %c6, %c0_65] : memref<2x8x4xf32, #tpu.memory_space<vmem>>, vector<2x1x4xf32>
    %70 = vector.shape_cast %69 : vector<2x1x4xf32> to vector<2x4xf32>
    %71 = arith.addf %68, %70 : vector<2x4xf32>
    %c0_66 = arith.constant 0 : index
    %c6_67 = arith.constant 6 : index
    %c0_68 = arith.constant 0 : index
    %72 = vector.load %arg3[%c0_66, %c6_67, %c0_68] : memref<2x8x4xf32, #tpu.memory_space<vmem>>, vector<2x1x4xf32>
    %73 = vector.shape_cast %72 : vector<2x1x4xf32> to vector<2x4xf32>
    %74 = vector.shape_cast %71 : vector<2x4xf32> to vector<2x1x4xf32>
    tpu.vector_store %arg3[%c0_66, %c6_67, %c0_68], %74 {strides = array<i32>} : memref<2x8x4xf32, #tpu.memory_space<vmem>>, vector<2x1x4xf32>,
    %cst_69 = arith.constant dense<0.000000e+00> : vector<2x2xf32>
    %75 = tpu.matmul %71, %1, %cst_69 {dimension_numbers = #tpu.dot_dimension_numbers<[1], [0], [0], [1], [0, 0, 1, 1], [], []>} : vector<2x4xf32>, vector<4x2xf32>, vector<2x2xf32> -> vector<2x2xf32>
    %c0_70 = arith.constant 0 : index
    %c6_71 = arith.constant 6 : index
    %c0_72 = arith.constant 0 : index
    %76 = vector.load %arg4[%c0_70, %c6_71, %c0_72] : memref<2x8x2xf32, #tpu.memory_space<vmem>>, vector<2x1x2xf32>
    %77 = vector.shape_cast %76 : vector<2x1x2xf32> to vector<2x2xf32>
    %78 = vector.shape_cast %75 : vector<2x2xf32> to vector<2x1x2xf32>
    tpu.vector_store %arg4[%c0_70, %c6_71, %c0_72], %78 {strides = array<i32>} : memref<2x8x2xf32, #tpu.memory_space<vmem>>, vector<2x1x2xf32>,
    %cst_73 = arith.constant dense<0.000000e+00> : vector<2x4xf32>
    %79 = tpu.matmul %71, %0, %cst_73 {dimension_numbers = #tpu.dot_dimension_numbers<[1], [0], [0], [1], [0, 0, 1, 1], [], []>} : vector<2x4xf32>, vector<4x4xf32>, vector<2x4xf32> -> vector<2x4xf32>
    %c0_74 = arith.constant 0 : index
    %c7 = arith.constant 7 : index
    %c0_75 = arith.constant 0 : index
    %80 = vector.load %arg0[%c0_74, %c7, %c0_75] : memref<2x8x4xf32, #tpu.memory_space<vmem>>, vector<2x1x4xf32>
    %81 = vector.shape_cast %80 : vector<2x1x4xf32> to vector<2x4xf32>
    %82 = arith.addf %79, %81 : vector<2x4xf32>
    %c0_76 = arith.constant 0 : index
    %c7_77 = arith.constant 7 : index
    %c0_78 = arith.constant 0 : index
    %83 = vector.load %arg3[%c0_76, %c7_77, %c0_78] : memref<2x8x4xf32, #tpu.memory_space<vmem>>, vector<2x1x4xf32>
    %84 = vector.shape_cast %83 : vector<2x1x4xf32> to vector<2x4xf32>
    %85 = vector.shape_cast %82 : vector<2x4xf32> to vector<2x1x4xf32>
    tpu.vector_store %arg3[%c0_76, %c7_77, %c0_78], %85 {strides = array<i32>} : memref<2x8x4xf32, #tpu.memory_space<vmem>>, vector<2x1x4xf32>,
    %cst_79 = arith.constant dense<0.000000e+00> : vector<2x2xf32>
    %86 = tpu.matmul %82, %1, %cst_79 {dimension_numbers = #tpu.dot_dimension_numbers<[1], [0], [0], [1], [0, 0, 1, 1], [], []>} : vector<2x4xf32>, vector<4x2xf32>, vector<2x2xf32> -> vector<2x2xf32>
    %c0_80 = arith.constant 0 : index
    %c7_81 = arith.constant 7 : index
    %c0_82 = arith.constant 0 : index
    %87 = vector.load %arg4[%c0_80, %c7_81, %c0_82] : memref<2x8x2xf32, #tpu.memory_space<vmem>>, vector<2x1x2xf32>
    %88 = vector.shape_cast %87 : vector<2x1x2xf32> to vector<2x2xf32>
    %89 = vector.shape_cast %86 : vector<2x2xf32> to vector<2x1x2xf32>
    tpu.vector_store %arg4[%c0_80, %c7_81, %c0_82], %89 {strides = array<i32>} : memref<2x8x2xf32, #tpu.memory_space<vmem>>, vector<2x1x2xf32>,
    return
  }
}

</mosaic_0001>

<bundles_post_ra>
// kernel: cl_system_forward.1
= control target key start
LH: loop header
LB: loop body
LE: loop exit
PB: predicated region body
PF: predicated region fallthrough
CT: control target
= control target key end

     0   :  { %vm33_vm0 = vcmask 1043456   ;;  %vm22_vm1 = vcmask 24576   ;;  %vm28_vm2 = vcmask 1041409   ;;  %vm30_vm3 = vcmask 31744   ;;  %s762_s1 = inlined_call_operand.vmem [shape: f32[4,4], index: 1, kind: input, shape index: {}]   ;;  %s763_s0 = inlined_call_operand.vmem [shape: f32[2,8,4], index: 0, kind: input, shape index: {}]   ;;  %s764_s3 = inlined_call_operand.vmem [shape: f32[2,8,4], index: 3, kind: output, shape index: {0}]   ;;  %s765_s2 = inlined_call_operand.vmem [shape: f32[4,2], index: 2, kind: input, shape index: {}]   ;;  %s766_s4 = inlined_call_operand.vmem [shape: f32[2,8,2], index: 4, kind: output, shape index: {1}]  }
   0x1   :  { %v16_v0 = vld [vmem:[%s762_s1] sm:$0xf]  ;;  %v19_v2 = vld [vmem:[%s763_s0 + $0x8] sm:$0x1]  ;;  %v64_v6 = vld [vmem:[%s763_s0 + $0x9] sm:$0x1] }
   0x2   :  { %v18_v1 = vld [vmem:[%s763_s0] sm:$0x1]  ;;  %489 = vmatpush.msk.msra.mxu1 %vm33_vm0, %v16_v0  ;;  %v27_v3 = vrot.slane %v19_v2, 7  ;;  %493 = vmatpush.msk.msra.mxu3 %vm33_vm0, %v16_v0  ;;  %24 = vst.msk [vmem:[%s764_s3 + $0x8] sm:$0x1] %vm22_vm1, %v19_v2  ;;  %v67_v7 = vrot.slane %v64_v6, 7 }
   0x3   :  { %23 = vst.msk [vmem:[%s764_s3] sm:$0x1] %vm22_vm1, %v18_v1  ;;  %v17_v5 = vld [vmem:[%s765_s2] sm:$0xf]  ;;  %vm60_vm4 = vcmask 8192  }
   0x4   :  { %497 = vmatpush.msk.msrb.mxu1 %vm33_vm0, %v16_v0  ;;  %501 = vmatpush.msk.msrb.mxu3 %vm33_vm0, %v16_v0  ;;  %v29_v4 = vsel %vm28_vm2, %v27_v3, %v18_v1  ;;  %v63_v8 = vld [vmem:[%s763_s0 + $0x1] sm:$0x1]  ;;  %v126_v15 = vld [vmem:[%s763_s0 + $0xa] sm:$0x1]  ;;  %v125_v17 = vld [vmem:[%s763_s0 + $0x2] sm:$0x1] }
   0x5   :  { %490 = vmatmul.msk.f32.vlgmr.msra.gmra.mxu1 %vm30_vm3, %v29_v4  ;;  %491 = vmatpush.msk.msra.mxu2 %vm33_vm0, %v17_v5  ;;  %v68_v9 = vsel %vm28_vm2, %v67_v7, %v63_v8  ;;  %v129_v16 = vrot.slane %v126_v15, 7  ;;  %v185_v24 = vld [vmem:[%s763_s0 + $0xb] sm:$0x1]  ;;  %v184_v26 = vld [vmem:[%s763_s0 + $0x3] sm:$0x1] }
   0x6   :  { %505 = vmatpush.msk.msra.mxu1 %vm33_vm0, %v16_v0  ;;  %487 = vmatpush.msk.msra.mxu0 %vm33_vm0, %v17_v5  ;;  %v188_v25 = vrot.slane %v185_v24, 7  ;;  %v244_v33 = vld [vmem:[%s763_s0 + $0xc] sm:$0x1]  ;;  %v243_v35 = vld [vmem:[%s763_s0 + $0x4] sm:$0x1] }
   0x7   :  { %488 = vmatmul.msk.f32.vlgmr.msra.gmra.mxu0 %vm30_vm3, %v29_v4  ;;  %499 = vmatpush.msk.msrb.mxu2 %vm33_vm0, %v17_v5  ;;  %v130_v18 = vsel %vm28_vm2, %v129_v16, %v125_v17  ;;  %v247_v34 = vrot.slane %v244_v33, 7  ;;  %v303_v42 = vld [vmem:[%s763_s0 + $0xd] sm:$0x1]  ;;  %v302_v44 = vld [vmem:[%s763_s0 + $0x5] sm:$0x1] }
   0x8   :  { %495 = vmatpush.msk.msrb.mxu0 %vm33_vm0, %v17_v5  ;;  %v189_v27 = vsel %vm28_vm2, %v188_v25, %v184_v26  ;;  %v306_v43 = vrot.slane %v303_v42, 7  ;;  %v362_v51 = vld [vmem:[%s763_s0 + $0xe] sm:$0x1]  ;;  %v361_v53 = vld [vmem:[%s763_s0 + $0x6] sm:$0x1] }
   0x9   :  { %v248_v36 = vsel %vm28_vm2, %v247_v34, %v243_v35  ;;  %v365_v52 = vrot.slane %v362_v51, 7  ;;  %v421_v60 = vld [vmem:[%s763_s0 + $0xf] sm:$0x1]  ;;  %v420_v62 = vld [vmem:[%s763_s0 + $0x7] sm:$0x1] }
   0xa   :  { %503 = vmatpush.msk.msra.mxu0 %vm33_vm0, %v17_v5  ;;  %v307_v45 = vsel %vm28_vm2, %v306_v43, %v302_v44  ;;  %v424_v61 = vrot.slane %v421_v60, 7 }
   0xb   :  { %v366_v54 = vsel %vm28_vm2, %v365_v52, %v361_v53 }
   0xc   :  { %v425_v63 = vsel %vm28_vm2, %v424_v61, %v420_v62 }
  0x82   :  { %v90_v10 = vpop.f32.mrf.mxu1 }
  0x83   :  { %v91_v11 = vadd.f32 %v90_v10, %v68_v9 }
  0x84   :  { %v54_v13 = vpop.f32.mrf.mxu0 }
  0x85   :  { %v94_v12 = vrot.slane %v91_v11, 1  ;;  %96 = vst.msk [vmem:[%s764_s3 + $0x1] sm:$0x1] %vm22_vm1, %v91_v11  ;;  %492 = vmatmul.msk.f32.vlgmr.msra.gmra.mxu2 %vm30_vm3, %v91_v11  ;;  %494 = vmatmul.msk.f32.vlgmr.msra.gmra.mxu3 %vm30_vm3, %v91_v11  ;;  %v58_v14 = vrot.slane %v54_v13, 1 }
  0x86   :  { %509 = vmatpush.msk.msra.mxu3 %vm33_vm0, %v16_v0  ;;  %507 = vmatpush.msk.msra.mxu2 %vm33_vm0, %v17_v5  ;;  %61 = vst.msk [vmem:[%s766_s4] sm:$0x1] %vm60_vm4, %v54_v13 }
  0x87   :  { %97 = vst.msk [vmem:[%s764_s3 + $0x9] sm:$0x1] %vm22_vm1, %v94_v12 }
  0x88   :  { %62 = vst.msk [vmem:[%s766_s4 + $0x8] sm:$0x1] %vm60_vm4, %v58_v14 }
 0x108   :  { %v117_v19 = vpop.f32.mrf.mxu2  ;;  %v149_v20 = vpop.f32.mrf.mxu3 }
 0x109   :  { %v121_v21 = vrot.slane %v117_v19, 1  ;;  %123 = vst.msk [vmem:[%s766_s4 + $0x1] sm:$0x1] %vm60_vm4, %v117_v19  ;;  %v150_v22 = vadd.f32 %v149_v20, %v130_v18 }
 0x10b   :  { %124 = vst.msk [vmem:[%s766_s4 + $0x9] sm:$0x1] %vm60_vm4, %v121_v21  ;;  %v153_v23 = vrot.slane %v150_v22, 1  ;;  %496 = vmatmul.msk.f32.vlgmr.msrb.gmra.mxu0 %vm30_vm3, %v150_v22  ;;  %498 = vmatmul.msk.f32.vlgmr.msrb.gmra.mxu1 %vm30_vm3, %v150_v22 }
 0x10c   :  { %155 = vst.msk [vmem:[%s764_s3 + $0x2] sm:$0x1] %vm22_vm1, %v150_v22  ;;  %513 = vmatpush.msk.msrb.mxu1 %vm33_vm0, %v16_v0  ;;  %511 = vmatpush.msk.msrb.mxu0 %vm33_vm0, %v17_v5 }
 0x10d   :  { %156 = vst.msk [vmem:[%s764_s3 + $0xa] sm:$0x1] %vm22_vm1, %v153_v23 }
 0x188   :  { %v176_v28 = vpop.f32.mrf.mxu0  ;;  %v208_v29 = vpop.f32.mrf.mxu1 }
 0x189   :  { %v180_v30 = vrot.slane %v176_v28, 1  ;;  %182 = vst.msk [vmem:[%s766_s4 + $0x2] sm:$0x1] %vm60_vm4, %v176_v28  ;;  %v209_v31 = vadd.f32 %v208_v29, %v189_v27 }
 0x18b   :  { %183 = vst.msk [vmem:[%s766_s4 + $0xa] sm:$0x1] %vm60_vm4, %v180_v30  ;;  %v212_v32 = vrot.slane %v209_v31, 1  ;;  %500 = vmatmul.msk.f32.vlgmr.msrb.gmra.mxu2 %vm30_vm3, %v209_v31  ;;  %502 = vmatmul.msk.f32.vlgmr.msrb.gmra.mxu3 %vm30_vm3, %v209_v31 }
 0x18c   :  { %214 = vst.msk [vmem:[%s764_s3 + $0x3] sm:$0x1] %vm22_vm1, %v209_v31  ;;  %515 = vmatpush.msk.msrb.mxu2 %vm33_vm0, %v17_v5 }
 0x18d   :  { %215 = vst.msk [vmem:[%s764_s3 + $0xb] sm:$0x1] %vm22_vm1, %v212_v32 }
 0x20e   :  { %v235_v37 = vpop.f32.mrf.mxu2  ;;  %v267_v38 = vpop.f32.mrf.mxu3 }
 0x20f   :  { %v239_v39 = vrot.slane %v235_v37, 1  ;;  %241 = vst.msk [vmem:[%s766_s4 + $0x3] sm:$0x1] %vm60_vm4, %v235_v37  ;;  %v268_v40 = vadd.f32 %v267_v38, %v248_v36 }
 0x211   :  { %242 = vst.msk [vmem:[%s766_s4 + $0xb] sm:$0x1] %vm60_vm4, %v239_v39  ;;  %v271_v41 = vrot.slane %v268_v40, 1  ;;  %504 = vmatmul.msk.f32.vlgmr.msra.gmra.mxu0 %vm30_vm3, %v268_v40  ;;  %506 = vmatmul.msk.f32.vlgmr.msra.gmra.mxu1 %vm30_vm3, %v268_v40 }
 0x212   :  { %273 = vst.msk [vmem:[%s764_s3 + $0x4] sm:$0x1] %vm22_vm1, %v268_v40 }
 0x213   :  { %274 = vst.msk [vmem:[%s764_s3 + $0xc] sm:$0x1] %vm22_vm1, %v271_v41 }
 0x28e   :  { %v294_v46 = vpop.f32.mrf.mxu0  ;;  %v326_v47 = vpop.f32.mrf.mxu1 }
 0x28f   :  { %v298_v48 = vrot.slane %v294_v46, 1  ;;  %300 = vst.msk [vmem:[%s766_s4 + $0x4] sm:$0x1] %vm60_vm4, %v294_v46  ;;  %v327_v49 = vadd.f32 %v326_v47, %v307_v45 }
 0x291   :  { %301 = vst.msk [vmem:[%s766_s4 + $0xc] sm:$0x1] %vm60_vm4, %v298_v48  ;;  %v330_v50 = vrot.slane %v327_v49, 1  ;;  %508 = vmatmul.msk.f32.vlgmr.msra.gmra.mxu2 %vm30_vm3, %v327_v49  ;;  %510 = vmatmul.msk.f32.vlgmr.msra.gmra.mxu3 %vm30_vm3, %v327_v49 }
 0x292   :  { %332 = vst.msk [vmem:[%s764_s3 + $0x5] sm:$0x1] %vm22_vm1, %v327_v49 }
 0x293   :  { %333 = vst.msk [vmem:[%s764_s3 + $0xd] sm:$0x1] %vm22_vm1, %v330_v50 }
 0x314   :  { %v353_v55 = vpop.f32.mrf.mxu2  ;;  %v385_v56 = vpop.f32.mrf.mxu3 }
 0x315   :  { %v357_v57 = vrot.slane %v353_v55, 1  ;;  %359 = vst.msk [vmem:[%s766_s4 + $0x5] sm:$0x1] %vm60_vm4, %v353_v55  ;;  %v386_v58 = vadd.f32 %v385_v56, %v366_v54 }
 0x317   :  { %360 = vst.msk [vmem:[%s766_s4 + $0xd] sm:$0x1] %vm60_vm4, %v357_v57  ;;  %v389_v59 = vrot.slane %v386_v58, 1  ;;  %512 = vmatmul.msk.f32.vlgmr.msrb.gmra.mxu0 %vm30_vm3, %v386_v58  ;;  %514 = vmatmul.msk.f32.vlgmr.msrb.gmra.mxu1 %vm30_vm3, %v386_v58 }
 0x318   :  { %391 = vst.msk [vmem:[%s764_s3 + $0x6] sm:$0x1] %vm22_vm1, %v386_v58 }
 0x319   :  { %392 = vst.msk [vmem:[%s764_s3 + $0xe] sm:$0x1] %vm22_vm1, %v389_v59 }
 0x394   :  { %v412_v0 = vpop.f32.mrf.mxu0  ;;  %v444_v1 = vpop.f32.mrf.mxu1 }
 0x395   :  { %v416_v2 = vrot.slane %v412_v0, 1  ;;  %418 = vst.msk [vmem:[%s766_s4 + $0x6] sm:$0x1] %vm60_vm4, %v412_v0  ;;  %v445_v3 = vadd.f32 %v444_v1, %v425_v63 }
 0x397   :  { %419 = vst.msk [vmem:[%s766_s4 + $0xe] sm:$0x1] %vm60_vm4, %v416_v2  ;;  %v448_v4 = vrot.slane %v445_v3, 1  ;;  %516 = vmatmul.msk.f32.vlgmr.msrb.gmra.mxu2 %vm30_vm3, %v445_v3 }
 0x398   :  { %450 = vst.msk [vmem:[%s764_s3 + $0x7] sm:$0x1] %vm22_vm1, %v445_v3 }
 0x399   :  { %451 = vst.msk [vmem:[%s764_s3 + $0xf] sm:$0x1] %vm22_vm1, %v448_v4 }
 0x41a   :  { %v471_v5 = vpop.f32.mrf.mxu2 }
 0x41b   :  { %v475_v6 = vrot.slane %v471_v5, 1  ;;  %477 = vst.msk [vmem:[%s766_s4 + $0x7] sm:$0x1] %vm60_vm4, %v471_v5 }
 0x41d   :  { %478 = vst.msk [vmem:[%s766_s4 + $0xf] sm:$0x1] %vm60_vm4, %v475_v6 }

</bundles_post_ra>
